<compile_context>
chip_gen: v6e
topology: v6e:2x2x1
jax: 0.10.0
libtpu: 0.0.40
codegen_flags: <defaults>
</compile_context>

<pallas_src>
import jax
import jax.numpy as jnp
from jax.experimental import pallas as pl
from jax.experimental.pallas import tpu as pltpu

HIDDEN = 768        # BERT hidden size (bert-base pooled output)
NUM_CLASSES = 2     # nn.Linear(768, 2)


def head_kernel(x_ref, w_ref, b_ref, o_ref):
    """Fused linear + 2-class softmax head (sigmoid-of-difference form).

    x_ref: [TB, H]  pooled BERT embeddings tile (f32 or bf16)
    w_ref: [H, 2]   difference weights [wd, -wd] (f32 or bf16)
    b_ref: [1, 2]   difference bias [bd, -bd] (f32)
    o_ref: [TB, 2]  softmax probabilities (f32)
    """
    # MXU matmul with f32 accumulation; bias added to the f32 accumulator.
    z = jnp.dot(x_ref[...], w_ref[...], preferred_element_type=jnp.float32)
    z = z + b_ref[...]
    # softmax over 2 classes == elementwise sigmoid of the logit difference:
    # no cross-lane max/sum reductions, no per-row divide.
    o_ref[...] = 1.0 / (1.0 + jnp.exp(-z))


def predictor_head(x, w_t, b, *, block_b=1024, input_dtype=jnp.float32,
                   vmem_limit_bytes=None):
    """x: [B, H]; w_t: [H, 2] (PyTorch weight pre-transposed); b: [2] -> [B, 2]."""
    B, H = x.shape
    C = w_t.shape[1]
    assert C == NUM_CLASSES

    # Precompute the 2-class difference form in the wrapper (tiny, one-time).
    w_t = w_t.astype(jnp.float32)
    b = b.astype(jnp.float32)
    wd = w_t[:, 0:1] - w_t[:, 1:2]                       # [H, 1]
    w2 = jnp.concatenate([wd, -wd], axis=1)              # [H, 2]
    bd = (b[0] - b[1]).reshape(1, 1)
    b2 = jnp.concatenate([bd, -bd], axis=1)              # [1, 2], kept f32

    xk = x.astype(input_dtype)
    w2 = w2.astype(input_dtype)

    # Batch tiling: full-array block for small B, else block_b (multiple of 8)
    # with zero-padding for the remainder.
    if B <= block_b:
        tb, b_pad = B, B
    else:
        tb = block_b
        pad = (-B) % tb
        if pad:
            xk = jnp.pad(xk, ((0, pad), (0, 0)))
        b_pad = B + pad
    grid = (pl.cdiv(b_pad, tb),)

    cp_kwargs = dict(dimension_semantics=("parallel",))
    if vmem_limit_bytes is not None:
        cp_kwargs["vmem_limit_bytes"] = vmem_limit_bytes

    out = pl.pallas_call(
        head_kernel,
        out_shape=jax.ShapeDtypeStruct((b_pad, C), jnp.float32),
        grid=grid,
        in_specs=[
            pl.BlockSpec((tb, H), lambda i: (i, 0)),    # x tile, pipelined
            pl.BlockSpec((H, C), lambda i: (0, 0)),     # resident weights
            pl.BlockSpec((1, C), lambda i: (0, 0)),     # resident bias
        ],
        out_specs=pl.BlockSpec((tb, C), lambda i: (i, 0)),
        compiler_params=pltpu.CompilerParams(**cp_kwargs),
    )(xk, w2, b2)

    return out[:B] if b_pad != B else out


def reference_head(x, w_t, b):
    logits = x @ w_t + b[None, :]
    return jax.nn.softmax(logits, axis=1)


if __name__ == "__main__":
    key = jax.random.PRNGKey(0)
    k_x, k_w, k_b = jax.random.split(key, 3)

    B = 8  # small batch of "sentences" (pooled embeddings)

    # Deterministic synthetic pooled BERT embeddings (stand-in for bert(tokens)[1]).
    x = jax.random.normal(k_x, (B, HIDDEN), dtype=jnp.float32)

    # Deterministic Linear(768, 2) parameters, PyTorch-style uniform init,
    # weight stored pre-transposed as [H, C].
    bound = 1.0 / jnp.sqrt(jnp.float32(HIDDEN))
    w_t = jax.random.uniform(k_w, (HIDDEN, NUM_CLASSES), dtype=jnp.float32,
                             minval=-bound, maxval=bound)
    b = jax.random.uniform(k_b, (NUM_CLASSES,), dtype=jnp.float32,
                           minval=-bound, maxval=bound)

    ref = reference_head(x, w_t, b)

    # 1) Small batch, f32, single full-array tile.
    out = jax.block_until_ready(predictor_head(x, w_t, b))
    assert out.shape == (B, NUM_CLASSES)
    assert jnp.allclose(out, ref, atol=1e-5, rtol=1e-5), "f32 mismatch vs reference"
    assert jnp.allclose(jnp.sum(out, axis=1), 1.0, atol=1e-5), "rows must sum to 1"

    # 2) Larger batch with a non-multiple tile -> exercises the tiled/padded
    #    "parallel" grid path (B=20, tile=16 -> pad to 32, grid=(2,)).
    B2 = 20
    x2 = jax.random.normal(jax.random.PRNGKey(1), (B2, HIDDEN), dtype=jnp.float32)
    out2 = jax.block_until_ready(predictor_head(x2, w_t, b, block_b=16))
    ref2 = reference_head(x2, w_t, b)
    assert out2.shape == (B2, NUM_CLASSES)
    assert jnp.allclose(out2, ref2, atol=1e-5, rtol=1e-5), "tiled f32 mismatch"

    # 3) bf16 input path (halves HBM traffic; f32 accumulation / sigmoid math).
    out_bf16 = jax.block_until_ready(
        predictor_head(x, w_t, b, input_dtype=jnp.bfloat16))
    assert out_bf16.shape == (B, NUM_CLASSES)
    assert jnp.allclose(out_bf16, ref, atol=3e-2), "bf16 mismatch vs reference"
    assert jnp.allclose(jnp.sum(out_bf16, axis=1), 1.0, atol=1e-5)

    print("KERNEL_OK")
</pallas_src>

<mosaic_0001>
module attributes {stable_mosaic.version = 11 : i64} {
  func.func @head_kernel(%arg0: i32, %arg1: memref<8x768xf32, #tpu.memory_space<vmem>>, %arg2: memref<768x2xf32, #tpu.memory_space<vmem>>, %arg3: memref<1x2xf32, #tpu.memory_space<vmem>>, %arg4: memref<8x2xf32, #tpu.memory_space<vmem>>) attributes {dimension_semantics = [#tpu.dimension_semantics<parallel>], iteration_bounds = array<i64: 1>, scalar_prefetch = 0 : i64, scratch_operands = 0 : i64, tpu.core_type = #tpu.core_type<tc>, window_params = [{transform_indices = @transform_0, window_bounds = array<i64: 8, 768>}, {pipeline_mode = #tpu.pipeline_mode<synchronous>, transform_indices = @transform_1, window_bounds = array<i64: 768, 2>}, {pipeline_mode = #tpu.pipeline_mode<synchronous>, transform_indices = @transform_2, window_bounds = array<i64: 1, 2>}, {transform_indices = @transform_3, window_bounds = array<i64: 8, 2>}]} {
    %c0 = arith.constant 0 : index
    %c0_0 = arith.constant 0 : index
    %0 = vector.load %arg1[%c0, %c0_0] : memref<8x768xf32, #tpu.memory_space<vmem>>, vector<8x768xf32>
    %c0_1 = arith.constant 0 : index
    %c0_2 = arith.constant 0 : index
    %1 = vector.load %arg2[%c0_1, %c0_2] : memref<768x2xf32, #tpu.memory_space<vmem>>, vector<768x2xf32>
    %cst = arith.constant dense<0.000000e+00> : vector<8x2xf32>
    %2 = tpu.matmul %0, %1, %cst {dimension_numbers = #tpu.dot_dimension_numbers<[1], [0], [0], [1], [0, 0, 1, 1], [], []>} : vector<8x768xf32>, vector<768x2xf32>, vector<8x2xf32> -> vector<8x2xf32>
    %c0_3 = arith.constant 0 : index
    %c0_4 = arith.constant 0 : index
    %3 = vector.load %arg3[%c0_3, %c0_4] : memref<1x2xf32, #tpu.memory_space<vmem>>, vector<1x2xf32>
    %4 = vector.broadcast %3 : vector<1x2xf32> to vector<8x2xf32>
    %5 = arith.addf %2, %4 : vector<8x2xf32>
    %cst_5 = arith.constant 0.000000e+00 : f32
    %6 = vector.broadcast %cst_5 : f32 to vector<8x2xf32>
    %7 = arith.subf %6, %5 : vector<8x2xf32>
    %8 = math.exp %7 : vector<8x2xf32>
    %cst_6 = arith.constant 1.000000e+00 : f32
    %9 = vector.broadcast %cst_6 : f32 to vector<8x2xf32>
    %10 = arith.addf %9, %8 : vector<8x2xf32>
    %cst_7 = arith.constant 1.000000e+00 : f32
    %11 = vector.broadcast %cst_7 : f32 to vector<8x2xf32>
    %12 = arith.divf %11, %10 : vector<8x2xf32>
    %c0_8 = arith.constant 0 : index
    %c0_9 = arith.constant 0 : index
    %13 = vector.load %arg4[%c0_8, %c0_9] : memref<8x2xf32, #tpu.memory_space<vmem>>, vector<8x2xf32>
    tpu.vector_store %arg4[%c0_8, %c0_9], %12 {strides = array<i32>} : memref<8x2xf32, #tpu.memory_space<vmem>>, vector<8x2xf32>,
    return
  }
  func.func @transform_0(%arg0: i32) -> (i32, i32) {
    %c0_i32 = arith.constant 0 : i32
    %c0_i32_0 = arith.constant 0 : i32
    return %arg0, %c0_i32 : i32, i32
  }
  func.func @transform_1(%arg0: i32) -> (i32, i32) {
    %c0_i32 = arith.constant 0 : i32
    %c0_i32_0 = arith.constant 0 : i32
    %c0_i32_1 = arith.constant 0 : i32
    return %c0_i32, %c0_i32_0 : i32, i32
  }
  func.func @transform_2(%arg0: i32) -> (i32, i32) {
    %c0_i32 = arith.constant 0 : i32
    %c0_i32_0 = arith.constant 0 : i32
    %c0_i32_1 = arith.constant 0 : i32
    return %c0_i32, %c0_i32_0 : i32, i32
  }
  func.func @transform_3(%arg0: i32) -> (i32, i32) {
    %c0_i32 = arith.constant 0 : i32
    %c0_i32_0 = arith.constant 0 : i32
    return %arg0, %c0_i32 : i32, i32
  }
}

</mosaic_0001>

<bundles_post_ra>
// kernel: tpu_custom_call.1
= control target key start
LH: loop header
LB: loop body
LE: loop exit
PB: predicated region body
PF: predicated region fallthrough
CT: control target
= control target key end

     0   :  { %vm339_vm0 = vcmask 15360   ;;  %s787_s1 = inlined_call_operand.vmem [shape: f32[768,2], index: 1, kind: input, shape index: {}]   ;;  %s788_s0 = inlined_call_operand.vmem [shape: f32[8,768], index: 0, kind: input, shape index: {}]   ;;  %s789_s2 = inlined_call_operand.vmem [shape: f32[1,2], index: 2, kind: input, shape index: {}]   ;;  %s790_s3 = inlined_call_operand.vmem [shape: f32[8,2], index: 3, kind: output, shape index: {}]  }
   0x1   :  { %v51_v0 = vld [vmem:[%s787_s1 + $0xf8] sm:$0xff]  ;;  %v50_v2 = vld [vmem:[%s787_s1 + $0xf0] sm:$0xff]  ;;  %v49_v6 = vld [vmem:[%s787_s1 + $0xe8] sm:$0xff] }
   0x2   :  { %v35_v1 = vld [vmem:[%s787_s1 + $0x78] sm:$0xff]  ;;  %346 = vmatprep.subr.mxu0 %v51_v0  ;;  %v34_v4 = vld [vmem:[%s787_s1 + $0x70] sm:$0xff]  ;;  %v33_v8 = vld [vmem:[%s787_s1 + $0x68] sm:$0xff] }
   0x3   :  { %v83_v3 = vld [vmem:[%s787_s1 + $0x1f8] sm:$0xff]  ;;  %347 = vmatpush3.msra.mxu0 %v35_v1  ;;  %v82_v7 = vld [vmem:[%s787_s1 + $0x1f0] sm:$0xff]  ;;  %v81_v10 = vld [vmem:[%s787_s1 + $0x1e8] sm:$0xff] }
   0x4   :  { %v67_v5 = vld [vmem:[%s787_s1 + $0x178] sm:$0xff]  ;;  %381 = vmatprep.subr.mxu1 %v83_v3  ;;  %348 = vmatprep.subr.mxu0 %v50_v2  ;;  %v66_v9 = vld [vmem:[%s787_s1 + $0x170] sm:$0xff]  ;;  %v48_v11 = vld [vmem:[%s787_s1 + $0xe0] sm:$0xff] }
   0x5   :  { %382 = vmatpush3.msra.mxu1 %v67_v5  ;;  %349 = vmatpush3.msra.mxu0 %v34_v4  ;;  %v65_v12 = vld [vmem:[%s787_s1 + $0x168] sm:$0xff]  ;;  %v32_v13 = vld [vmem:[%s787_s1 + $0x60] sm:$0xff]  ;;  %v47_v15 = vld [vmem:[%s787_s1 + $0xd8] sm:$0xff] }
   0x6   :  { %383 = vmatprep.subr.mxu1 %v82_v7  ;;  %350 = vmatprep.subr.mxu0 %v49_v6  ;;  %v80_v14 = vld [vmem:[%s787_s1 + $0x1e0] sm:$0xff]  ;;  %v31_v17 = vld [vmem:[%s787_s1 + $0x58] sm:$0xff]  ;;  %v46_v19 = vld [vmem:[%s787_s1 + $0xd0] sm:$0xff] }
   0x7   :  { %384 = vmatpush3.msra.mxu1 %v66_v9  ;;  %351 = vmatpush3.msra.mxu0 %v33_v8  ;;  %v64_v16 = vld [vmem:[%s787_s1 + $0x160] sm:$0xff]  ;;  %v79_v18 = vld [vmem:[%s787_s1 + $0x1d8] sm:$0xff]  ;;  %v30_v21 = vld [vmem:[%s787_s1 + $0x50] sm:$0xff] }
   0x8   :  { %385 = vmatprep.subr.mxu1 %v81_v10  ;;  %352 = vmatprep.subr.mxu0 %v48_v11  ;;  %v63_v20 = vld [vmem:[%s787_s1 + $0x158] sm:$0xff]  ;;  %v78_v22 = vld [vmem:[%s787_s1 + $0x1d0] sm:$0xff]  ;;  %v45_v23 = vld [vmem:[%s787_s1 + $0xc8] sm:$0xff] }
   0x9   :  { %386 = vmatpush3.msra.mxu1 %v65_v12  ;;  %353 = vmatpush3.msra.mxu0 %v32_v13  ;;  %v62_v24 = vld [vmem:[%s787_s1 + $0x150] sm:$0xff]  ;;  %v29_v25 = vld [vmem:[%s787_s1 + $0x48] sm:$0xff]  ;;  %v44_v27 = vld [vmem:[%s787_s1 + $0xc0] sm:$0xff] }
   0xa   :  { %387 = vmatprep.subr.mxu1 %v80_v14  ;;  %354 = vmatprep.subr.mxu0 %v47_v15  ;;  %v77_v26 = vld [vmem:[%s787_s1 + $0x1c8] sm:$0xff]  ;;  %v28_v29 = vld [vmem:[%s787_s1 + $0x40] sm:$0xff]  ;;  %v43_v31 = vld [vmem:[%s787_s1 + $0xb8] sm:$0xff] }
   0xb   :  { %388 = vmatpush3.msra.mxu1 %v64_v16  ;;  %355 = vmatpush3.msra.mxu0 %v31_v17  ;;  %v61_v28 = vld [vmem:[%s787_s1 + $0x148] sm:$0xff]  ;;  %v76_v30 = vld [vmem:[%s787_s1 + $0x1c0] sm:$0xff]  ;;  %v27_v33 = vld [vmem:[%s787_s1 + $0x38] sm:$0xff] }
   0xc   :  { %389 = vmatprep.subr.mxu1 %v79_v18  ;;  %356 = vmatprep.subr.mxu0 %v46_v19  ;;  %v60_v32 = vld [vmem:[%s787_s1 + $0x140] sm:$0xff]  ;;  %v75_v34 = vld [vmem:[%s787_s1 + $0x1b8] sm:$0xff]  ;;  %v42_v35 = vld [vmem:[%s787_s1 + $0xb0] sm:$0xff] }
   0xd   :  { %390 = vmatpush3.msra.mxu1 %v63_v20  ;;  %357 = vmatpush3.msra.mxu0 %v30_v21  ;;  %v59_v36 = vld [vmem:[%s787_s1 + $0x138] sm:$0xff]  ;;  %v26_v37 = vld [vmem:[%s787_s1 + $0x30] sm:$0xff]  ;;  %v41_v39 = vld [vmem:[%s787_s1 + $0xa8] sm:$0xff] }
   0xe   :  { %391 = vmatprep.subr.mxu1 %v78_v22  ;;  %358 = vmatprep.subr.mxu0 %v45_v23  ;;  %v74_v38 = vld [vmem:[%s787_s1 + $0x1b0] sm:$0xff]  ;;  %v25_v41 = vld [vmem:[%s787_s1 + $0x28] sm:$0xff]  ;;  %v40_v43 = vld [vmem:[%s787_s1 + $0xa0] sm:$0xff] }
   0xf   :  { %392 = vmatpush3.msra.mxu1 %v62_v24  ;;  %359 = vmatpush3.msra.mxu0 %v29_v25  ;;  %v58_v40 = vld [vmem:[%s787_s1 + $0x130] sm:$0xff]  ;;  %v73_v42 = vld [vmem:[%s787_s1 + $0x1a8] sm:$0xff]  ;;  %v24_v45 = vld [vmem:[%s787_s1 + $0x20] sm:$0xff] }
  0x10   :  { %393 = vmatprep.subr.mxu1 %v77_v26  ;;  %360 = vmatprep.subr.mxu0 %v44_v27  ;;  %v57_v44 = vld [vmem:[%s787_s1 + $0x128] sm:$0xff]  ;;  %v72_v46 = vld [vmem:[%s787_s1 + $0x1a0] sm:$0xff]  ;;  %v39_v47 = vld [vmem:[%s787_s1 + $0x98] sm:$0xff] }
  0x11   :  { %394 = vmatpush3.msra.mxu1 %v61_v28  ;;  %361 = vmatpush3.msra.mxu0 %v28_v29  ;;  %v56_v48 = vld [vmem:[%s787_s1 + $0x120] sm:$0xff]  ;;  %v23_v49 = vld [vmem:[%s787_s1 + $0x18] sm:$0xff]  ;;  %v38_v51 = vld [vmem:[%s787_s1 + $0x90] sm:$0xff] }
  0x12   :  { %395 = vmatprep.subr.mxu1 %v76_v30  ;;  %362 = vmatprep.subr.mxu0 %v43_v31  ;;  %v71_v50 = vld [vmem:[%s787_s1 + $0x198] sm:$0xff]  ;;  %v22_v53 = vld [vmem:[%s787_s1 + $0x10] sm:$0xff]  ;;  %v37_v55 = vld [vmem:[%s787_s1 + $0x88] sm:$0xff] }
  0x13   :  { %396 = vmatpush3.msra.mxu1 %v60_v32  ;;  %363 = vmatpush3.msra.mxu0 %v27_v33  ;;  %v55_v52 = vld [vmem:[%s787_s1 + $0x118] sm:$0xff]  ;;  %v70_v54 = vld [vmem:[%s787_s1 + $0x190] sm:$0xff]  ;;  %v21_v57 = vld [vmem:[%s787_s1 + $0x8] sm:$0xff] }
  0x14   :  { %397 = vmatprep.subr.mxu1 %v75_v34  ;;  %364 = vmatprep.subr.mxu0 %v42_v35  ;;  %v54_v56 = vld [vmem:[%s787_s1 + $0x110] sm:$0xff]  ;;  %v69_v58 = vld [vmem:[%s787_s1 + $0x188] sm:$0xff]  ;;  %v36_v59 = vld [vmem:[%s787_s1 + $0x80] sm:$0xff] }
  0x15   :  { %398 = vmatpush3.msra.mxu1 %v59_v36  ;;  %365 = vmatpush3.msra.mxu0 %v26_v37  ;;  %v15_v60 = vld [vmem:[%s788_s0 + $0x8] sm:$0xff]  ;;  %v20_v61 = vld [vmem:[%s787_s1] sm:$0xff]  ;;  %v115_v1 = vld [vmem:[%s787_s1 + $0x2f8] sm:$0xff] }
  0x16   :  { %399 = vmatprep.subr.mxu1 %v74_v38  ;;  %366 = vmatprep.subr.mxu0 %v41_v39  ;;  %v53_v62 = vld [vmem:[%s787_s1 + $0x108] sm:$0xff]  ;;  %v14_v63 = vld [vmem:[%s788_s0] sm:$0xff]  ;;  %v17_v3 = vld [vmem:[%s788_s0 + $0x18] sm:$0xff] }
  0x17   :  { %400 = vmatpush3.msra.mxu1 %v58_v40  ;;  %367 = vmatpush3.msra.mxu0 %v25_v41  ;;  %v68_v0 = vld [vmem:[%s787_s1 + $0x180] sm:$0xff]  ;;  %v99_v4 = vld [vmem:[%s787_s1 + $0x278] sm:$0xff]  ;;  %v16_v5 = vld [vmem:[%s788_s0 + $0x10] sm:$0xff] }
  0x18   :  { %401 = vmatprep.subr.mxu1 %v73_v42  ;;  %368 = vmatprep.subr.mxu0 %v40_v43  ;;  %v52_v2 = vld [vmem:[%s787_s1 + $0x100] sm:$0xff]  ;;  %v114_v6 = vld [vmem:[%s787_s1 + $0x2f0] sm:$0xff]  ;;  %v19_v8 = vld [vmem:[%s788_s0 + $0x28] sm:$0xff] }
  0x19   :  { %402 = vmatpush3.msra.mxu1 %v57_v44  ;;  %369 = vmatpush3.msra.mxu0 %v24_v45  ;;  %v98_v7 = vld [vmem:[%s787_s1 + $0x270] sm:$0xff]  ;;  %v113_v9 = vld [vmem:[%s787_s1 + $0x2e8] sm:$0xff]  ;;  %v112_v11 = vld [vmem:[%s787_s1 + $0x2e0] sm:$0xff] }
  0x1a   :  { %403 = vmatprep.subr.mxu1 %v72_v46  ;;  %370 = vmatprep.subr.mxu0 %v39_v47  ;;  %v97_v10 = vld [vmem:[%s787_s1 + $0x268] sm:$0xff]  ;;  %v96_v12 = vld [vmem:[%s787_s1 + $0x260] sm:$0xff]  ;;  %v111_v13 = vld [vmem:[%s787_s1 + $0x2d8] sm:$0xff] }
  0x1b   :  { %404 = vmatpush3.msra.mxu1 %v56_v48  ;;  %371 = vmatpush3.msra.mxu0 %v23_v49  ;;  %v95_v14 = vld [vmem:[%s787_s1 + $0x258] sm:$0xff]  ;;  %v110_v15 = vld [vmem:[%s787_s1 + $0x2d0] sm:$0xff]  ;;  %v109_v17 = vld [vmem:[%s787_s1 + $0x2c8] sm:$0xff] }
  0x1c   :  { %405 = vmatprep.subr.mxu1 %v71_v50  ;;  %372 = vmatprep.subr.mxu0 %v38_v51  ;;  %v94_v16 = vld [vmem:[%s787_s1 + $0x250] sm:$0xff]  ;;  %v93_v18 = vld [vmem:[%s787_s1 + $0x248] sm:$0xff]  ;;  %v108_v19 = vld [vmem:[%s787_s1 + $0x2c0] sm:$0xff] }
  0x1d   :  { %406 = vmatpush3.msra.mxu1 %v55_v52  ;;  %373 = vmatpush3.msra.mxu0 %v22_v53  ;;  %v92_v20 = vld [vmem:[%s787_s1 + $0x240] sm:$0xff]  ;;  %v107_v21 = vld [vmem:[%s787_s1 + $0x2b8] sm:$0xff]  ;;  %v106_v23 = vld [vmem:[%s787_s1 + $0x2b0] sm:$0xff] }
  0x1e   :  { %407 = vmatprep.subr.mxu1 %v70_v54  ;;  %374 = vmatprep.subr.mxu0 %v37_v55  ;;  %v91_v22 = vld [vmem:[%s787_s1 + $0x238] sm:$0xff]  ;;  %v90_v24 = vld [vmem:[%s787_s1 + $0x230] sm:$0xff]  ;;  %v105_v25 = vld [vmem:[%s787_s1 + $0x2a8] sm:$0xff] }
  0x1f   :  { %408 = vmatpush3.msra.mxu1 %v54_v56  ;;  %375 = vmatpush3.msra.mxu0 %v21_v57  ;;  %v89_v26 = vld [vmem:[%s787_s1 + $0x228] sm:$0xff]  ;;  %v104_v27 = vld [vmem:[%s787_s1 + $0x2a0] sm:$0xff]  ;;  %v103_v29 = vld [vmem:[%s787_s1 + $0x298] sm:$0xff] }
  0x20   :  { %409 = vmatprep.subr.mxu1 %v69_v58  ;;  %376 = vmatprep.subr.mxu0 %v36_v59  ;;  %v88_v28 = vld [vmem:[%s787_s1 + $0x220] sm:$0xff]  ;;  %v87_v30 = vld [vmem:[%s787_s1 + $0x218] sm:$0xff]  ;;  %v102_v31 = vld [vmem:[%s787_s1 + $0x290] sm:$0xff] }
  0x21   :  { %187 = vmatprep.mubr.f32.mxu0 %v15_v60  ;;  %377 = vmatpush3.msra.mxu0 %v20_v61  ;;  %v86_v32 = vld [vmem:[%s787_s1 + $0x210] sm:$0xff]  ;;  %v101_v33 = vld [vmem:[%s787_s1 + $0x288] sm:$0xff]  ;;  %v100_v35 = vld [vmem:[%s787_s1 + $0x280] sm:$0xff] }
  0x22   :  { %410 = vmatpush3.msra.mxu1 %v53_v62  ;;  %188 = vmatmul.mubr.f32.vlgmr.msra.gmra.mxu0 %v14_v63  ;;  %v85_v34 = vld [vmem:[%s787_s1 + $0x208] sm:$0xff]  ;;  %v84_v36 = vld [vmem:[%s787_s1 + $0x200] sm:$0xff] }
  0x23   :  { %411 = vmatprep.subr.mxu1 %v68_v0  ;;  %416 = vmatprep.subr.mxu0 %v115_v1  ;;  %v18_v37 = vld [vmem:[%s788_s0 + $0x20] sm:$0xff] }
  0x24   :  { %412 = vmatpush3.msra.mxu1 %v52_v2  ;;  %257 = vmatprep.mubr.f32.mxu1 %v17_v3  ;;  %v345_v42 = vld [vmem:[%s789_s2] ss:$0 sm:$0xff] }
  0x25   :  { %417 = vmatpush3.msra.mxu0 %v99_v4  ;;  %258 = vmatmul.mubr.f32.vlgmr.msra.gmra.mxu1 %v16_v5 }
  0x26   :  { %418 = vmatprep.subr.mxu0 %v114_v6  ;;  %327 = vmatprep.mubr.f32.mxu0 %v19_v8 }
  0x27   :  { %419 = vmatpush3.msra.mxu0 %v98_v7 }
  0x28   :  { %420 = vmatprep.subr.mxu0 %v113_v9 }
  0x29   :  { %421 = vmatpush3.msra.mxu0 %v97_v10 }
  0x2a   :  { %422 = vmatprep.subr.mxu0 %v112_v11 }
  0x2b   :  { %423 = vmatpush3.msra.mxu0 %v96_v12 }
  0x2c   :  { %424 = vmatprep.subr.mxu0 %v111_v13 }
  0x2d   :  { %425 = vmatpush3.msra.mxu0 %v95_v14 }
  0x2e   :  { %426 = vmatprep.subr.mxu0 %v110_v15 }
  0x2f   :  { %427 = vmatpush3.msra.mxu0 %v94_v16 }
  0x30   :  { %428 = vmatprep.subr.mxu0 %v109_v17 }
  0x31   :  { %429 = vmatpush3.msra.mxu0 %v93_v18 }
  0x32   :  { %430 = vmatprep.subr.mxu0 %v108_v19 }
  0x33   :  { %431 = vmatpush3.msra.mxu0 %v92_v20 }
  0x34   :  { %432 = vmatprep.subr.mxu0 %v107_v21 }
  0x35   :  { %433 = vmatpush3.msra.mxu0 %v91_v22 }
  0x36   :  { %434 = vmatprep.subr.mxu0 %v106_v23 }
  0x37   :  { %435 = vmatpush3.msra.mxu0 %v90_v24 }
  0x38   :  { %436 = vmatprep.subr.mxu0 %v105_v25 }
  0x39   :  { %437 = vmatpush3.msra.mxu0 %v89_v26 }
  0x3a   :  { %438 = vmatprep.subr.mxu0 %v104_v27 }
  0x3b   :  { %439 = vmatpush3.msra.mxu0 %v88_v28 }
  0x3c   :  { %440 = vmatprep.subr.mxu0 %v103_v29 }
  0x3d   :  { %441 = vmatpush3.msra.mxu0 %v87_v30 }
  0x3e   :  { %442 = vmatprep.subr.mxu0 %v102_v31 }
  0x3f   :  { %443 = vmatpush3.msra.mxu0 %v86_v32 }
  0x40   :  { %444 = vmatprep.subr.mxu0 %v101_v33 }
  0x41   :  { %445 = vmatpush3.msra.mxu0 %v85_v34 }
  0x42   :  { %446 = vmatprep.subr.mxu0 %v100_v35 }
  0x43   :  { %447 = vmatpush3.msra.mxu0 %v84_v36 }
  0x44   :  { %328 = vmatmul.mubr.f32.vlgmr.msra.gmra.mxu0 %v18_v37 }
  0xe2   :  { %v378_v38 = vpop.f32.mrf.mxu0 }
  0xe4   :  { %v379_v39 = vpop.f32.mrf.mxu0 }
  0xe5   :  { %v413_v40 = vpop.f32.mrf.mxu1  ;;  %v380_v41 = vadd.f32 %v379_v39, %v378_v38 }
  0xe7   :  { %v414_v43 = vpop.f32.mrf.mxu1  ;;  %v190_v44 = vadd.f32 %v380_v41, %v345_v42 }
  0xe8   :  { %v415_v45 = vadd.f32 %v414_v43, %v413_v40 }
  0xea   :  { %v260_v48 = vadd.f32 %v415_v45, %v190_v44 }
 0x104   :  { %v448_v46 = vpop.f32.mrf.mxu0 }
 0x106   :  { %v449_v47 = vpop.f32.mrf.mxu0 }
 0x107   :  { %v450_v49 = vadd.f32 %v449_v47, %v448_v46 }
 0x109   :  { %v330_v50 = vadd.f32 %v450_v49, %v260_v48 }
 0x10b   :  { %v333_v51 = vsub.f32 0.0, %v330_v50 }
 0x10d   :  { %v334_v52 = vmul.f32 1.442695, %v333_v51 }
 0x10f   :  { %451 = vpow2.f32 %v334_v52 }
 0x11c   :  { %v452_v53 = vpop.eup %451 }
 0x11d   :  { %v336_v54 = vadd.f32 1.0, %v452_v53 }
 0x11f   :  { %453 = vrcp.f32 %v336_v54 }
 0x12c   :  { %v454_v55 = vpop.eup %453 }
 0x12d   :  { %340 = vst.msk [vmem:[%s790_s3] sm:$0xff] %vm339_vm0, %v454_v55 }

</bundles_post_ra>
